<compile_context>
chip_gen: v5e
topology: v5e:2x2
jax: 0.10.0
libtpu: 0.0.40
codegen_flags: <defaults>
</compile_context>

<pallas_src>
import jax
import jax.numpy as jnp
import numpy as np
from jax import lax
from jax.experimental import pallas as pl
from jax.experimental.pallas import tpu as pltpu


def _round_up(x, m):
    return ((x + m - 1) // m) * m


def _choose_tile_h(H, w_padded, c_total, tile_h=None):
    """Pick an H tile (multiple of 8) so the combined flow+img tile is ~3 MiB."""
    if tile_h is None:
        budget_bytes = 3 * 1024 * 1024           # combined f32 tile budget
        rows = budget_bytes // (c_total * w_padded * 4)
        tile_h = max(8, (rows // 8) * 8)
    tile_h = max(8, _round_up(int(tile_h), 8))
    n_tiles = max(1, (H + tile_h - 1) // tile_h)
    tile_h = _round_up(-(-H // n_tiles), 8)      # rebalance, keep multiple of 8
    return tile_h, n_tiles


def _pad_hw(x, hp, wp):
    n, c, h, w = x.shape
    if hp == h and wp == w:
        return x
    return jnp.pad(x, ((0, 0), (0, 0), (0, hp - h), (0, wp - w)))


def _make_kernel(*, Ci, H, W, TH, weight_sq, edge_aware, inv_cnt_h, inv_cnt_w):
    inv_ci = 1.0 / float(Ci)

    def kernel(flow_ref, img_ref, out_ref, cflow_ref, cimg_ref):
        n = pl.program_id(0)
        h = pl.program_id(1)

        @pl.when(jnp.logical_and(n == 0, h == 0))
        def _init():
            out_ref[...] = jnp.zeros((1, 1), jnp.float32)

        flow = flow_ref[...].astype(jnp.float32)     # (Cf, TH, Wp)
        img = img_ref[...].astype(jnp.float32)       # (Ci, TH, Wp)
        row0 = h * TH                                # global row of tile row 0

        # ---------------- W-direction (lane axis) ----------------
        f_dw = jnp.sum(jnp.abs(flow[:, :, 1:] - flow[:, :, :-1]), axis=0)
        if edge_aware:
            i_dw = img[:, :, 1:] - img[:, :, :-1]
            i_gw = jnp.sum(i_dw * i_dw, axis=0) * inv_ci
            contrib_w = jnp.exp(-weight_sq * i_gw) * f_dw
        else:
            contrib_w = f_dw
        col_w = lax.broadcasted_iota(jnp.int32, contrib_w.shape, 1)
        row_w = lax.broadcasted_iota(jnp.int32, contrib_w.shape, 0) + row0
        mask_w = jnp.logical_and(col_w < (W - 1), row_w < H)
        sum_w = jnp.sum(jnp.where(mask_w, contrib_w, 0.0), keepdims=True)

        # ------------- H-direction, pairs inside this tile -------------
        f_dh = jnp.sum(jnp.abs(flow[:, 1:, :] - flow[:, :-1, :]), axis=0)
        if edge_aware:
            i_dh = img[:, 1:, :] - img[:, :-1, :]
            i_gh = jnp.sum(i_dh * i_dh, axis=0) * inv_ci
            contrib_h = jnp.exp(-weight_sq * i_gh) * f_dh
        else:
            contrib_h = f_dh
        col_h = lax.broadcasted_iota(jnp.int32, contrib_h.shape, 1)
        row_h = lax.broadcasted_iota(jnp.int32, contrib_h.shape, 0) + row0
        mask_h = jnp.logical_and(col_h < W, row_h < (H - 1))
        sum_h = jnp.sum(jnp.where(mask_h, contrib_h, 0.0), keepdims=True)

        out_ref[...] = out_ref[...] + (sum_h * inv_cnt_h + sum_w * inv_cnt_w)

        # ---- H-direction pair straddling the tile boundary (row carry) ----
        @pl.when(h > 0)
        def _boundary():
            prev_f = cflow_ref[...]                  # last row of tile h-1
            fd = jnp.sum(jnp.abs(flow[:, 0:1, :] - prev_f), axis=0)   # (1, Wp)
            if edge_aware:
                idf = img[:, 0:1, :] - cimg_ref[...]
                ig = jnp.sum(idf * idf, axis=0) * inv_ci
                contrib_b = jnp.exp(-weight_sq * ig) * fd
            else:
                contrib_b = fd
            col_b = lax.broadcasted_iota(jnp.int32, contrib_b.shape, 1)
            sum_b = jnp.sum(jnp.where(col_b < W, contrib_b, 0.0), keepdims=True)
            out_ref[...] = out_ref[...] + sum_b * inv_cnt_h

        # Carry this tile's last row for the next H tile of the same image.
        cflow_ref[...] = flow[:, TH - 1:TH, :]
        cimg_ref[...] = img[:, TH - 1:TH, :]

    return kernel


def set_smoothness_loss(flow, img, *, weight=150.0, edge_aware=True, tile_h=None):
    """Pallas-TPU forward of set_smoothness_loss.  flow:(N,Cf,H,W) img:(N,Ci,H,W)."""
    N, Cf, H, W = flow.shape
    Ni, Ci, Hi, Wi = img.shape
    assert (N, H, W) == (Ni, Hi, Wi), "flow/img batch + spatial shapes must match"

    Wp = _round_up(W, 128)                           # lane-dense last dim
    TH, n_h = _choose_tile_h(H, Wp, Cf + Ci, tile_h)
    Hp = TH * n_h

    flow_p = _pad_hw(flow, Hp, Wp)
    img_p = _pad_hw(img, Hp, Wp)

    weight_sq = float(weight) ** 2
    # Per-direction normalizers (0.5 final factor folded in).
    inv_cnt_h = 0.5 / float(N * Cf * (H - 1) * W)
    inv_cnt_w = 0.5 / float(N * Cf * H * (W - 1))

    kernel = _make_kernel(Ci=Ci, H=H, W=W, TH=TH, weight_sq=weight_sq,
                          edge_aware=edge_aware,
                          inv_cnt_h=inv_cnt_h, inv_cnt_w=inv_cnt_w)

    out = pl.pallas_call(
        kernel,
        out_shape=jax.ShapeDtypeStruct((1, 1), jnp.float32),
        grid_spec=pltpu.PrefetchScalarGridSpec(
            num_scalar_prefetch=0,
            grid=(N, n_h),
            in_specs=[
                pl.BlockSpec((None, Cf, TH, Wp), lambda n, h: (n, 0, h, 0)),
                pl.BlockSpec((None, Ci, TH, Wp), lambda n, h: (n, 0, h, 0)),
            ],
            out_specs=pl.BlockSpec((1, 1), lambda n, h: (0, 0)),
            scratch_shapes=[
                pltpu.VMEM((Cf, 1, Wp), jnp.float32),   # carry: last flow row
                pltpu.VMEM((Ci, 1, Wp), jnp.float32),   # carry: last img row
            ]),
        compiler_params=pltpu.CompilerParams(
            # Single revisited scalar output + row carry => sequential axes.
            dimension_semantics=("arbitrary", "arbitrary"),
            vmem_limit_bytes=32 * 1024 * 1024),
    )(flow_p, img_p)
    return out[0, 0]


def _reference(flow, img, weight=150.0, edge_aware=True):
    w2 = float(weight) ** 2
    flow = flow.astype(jnp.float32)
    img = img.astype(jnp.float32)
    img_gh = jnp.mean((img[:, :, 1:, :] - img[:, :, :-1, :]) ** 2, axis=1, keepdims=True)
    img_gw = jnp.mean((img[:, :, :, 1:] - img[:, :, :, :-1]) ** 2, axis=1, keepdims=True)
    f_gh = jnp.abs(flow[:, :, 1:, :] - flow[:, :, :-1, :])
    f_gw = jnp.abs(flow[:, :, :, 1:] - flow[:, :, :, :-1])
    if edge_aware:
        return (jnp.mean(jnp.exp(-w2 * img_gh) * f_gh)
                + jnp.mean(jnp.exp(-w2 * img_gw) * f_gw)) * 0.5
    return (jnp.mean(f_gh) + jnp.mean(f_gw)) * 0.5


if __name__ == "__main__":
    key = jax.random.PRNGKey(0)
    k1, k2, k3, k4 = jax.random.split(key, 4)

    # Case 1: module-consistent small shapes (flow 2ch, RGB img), single H tile.
    N, H, W = 2, 16, 16
    flow1 = jax.random.normal(k1, (N, 2, H, W), dtype=jnp.float32)
    # Scale image so exp(-22500 * grad^2) is not uniformly ~0.
    img1 = 0.01 * jax.random.normal(k2, (N, 3, H, W), dtype=jnp.float32)
    loss1 = set_smoothness_loss(flow1, img1)
    jax.block_until_ready(loss1)
    np.testing.assert_allclose(np.asarray(loss1), np.asarray(_reference(flow1, img1)),
                               rtol=1e-5, atol=1e-6)

    # Case 2: non-aligned H/W with forced H tiling (exercises masks + row carry).
    N2, H2, W2 = 2, 20, 24
    flow2 = jax.random.normal(k3, (N2, 2, H2, W2), dtype=jnp.float32)
    img2 = 0.01 * jax.random.normal(k4, (N2, 3, H2, W2), dtype=jnp.float32)
    loss2 = set_smoothness_loss(flow2, img2, tile_h=8)
    jax.block_until_ready(loss2)
    np.testing.assert_allclose(np.asarray(loss2), np.asarray(_reference(flow2, img2)),
                               rtol=1e-5, atol=1e-6)

    # Case 3: edge_aware=False branch.
    loss3 = set_smoothness_loss(flow2, img2, edge_aware=False, tile_h=8)
    jax.block_until_ready(loss3)
    np.testing.assert_allclose(np.asarray(loss3),
                               np.asarray(_reference(flow2, img2, edge_aware=False)),
                               rtol=1e-5, atol=1e-6)

    print("KERNEL_OK")
</pallas_src>

<mosaic_0001>
module attributes {stable_mosaic.version = 11 : i64} {
  func.func @kernel(%arg0: i32, %arg1: i32, %arg2: memref<1x2x16x128xf32, #tpu.memory_space<vmem>>, %arg3: memref<1x3x16x128xf32, #tpu.memory_space<vmem>>, %arg4: memref<1x1xf32, #tpu.memory_space<vmem>>, %arg5: memref<2x1x128xf32, #tpu.memory_space<vmem>>, %arg6: memref<3x1x128xf32, #tpu.memory_space<vmem>>) attributes {dimension_semantics = [#tpu.dimension_semantics<arbitrary>, #tpu.dimension_semantics<arbitrary>], iteration_bounds = array<i64: 2, 1>, scalar_prefetch = 0 : i64, scratch_operands = 2 : i64, tpu.core_type = #tpu.core_type<tc>, window_params = [{transform_indices = @transform_0, window_bounds = array<i64: 1, 2, 16, 128>}, {transform_indices = @transform_1, window_bounds = array<i64: 1, 3, 16, 128>}, {pipeline_mode = #tpu.pipeline_mode<synchronous>, transform_indices = @transform_2, window_bounds = array<i64: 1, 1>}]} {
    %c0_i32 = arith.constant 0 : i32
    %0 = arith.cmpi eq, %arg0, %c0_i32 : i32
    %c0_i32_0 = arith.constant 0 : i32
    %1 = arith.cmpi eq, %arg1, %c0_i32_0 : i32
    %2 = arith.andi %0, %1 : i1
    %3 = arith.extui %2 : i1 to i32
    %c0_i32_1 = arith.constant 0 : i32
    %4 = arith.cmpi ne, %3, %c0_i32_1 : i32
    scf.if %4 {
      %cst_37 = arith.constant 0.000000e+00 : f32
      %89 = vector.broadcast %cst_37 : f32 to vector<1x1xf32>
      %c0_38 = arith.constant 0 : index
      %c0_39 = arith.constant 0 : index
      %90 = vector.load %arg4[%c0_38, %c0_39] : memref<1x1xf32, #tpu.memory_space<vmem>>, vector<1x1xf32>
      tpu.vector_store %arg4[%c0_38, %c0_39], %89 {strides = array<i32>} : memref<1x1xf32, #tpu.memory_space<vmem>>, vector<1x1xf32>,
    } else {
    }
    %c0 = arith.constant 0 : index
    %c0_2 = arith.constant 0 : index
    %c0_3 = arith.constant 0 : index
    %c0_4 = arith.constant 0 : index
    %5 = vector.load %arg2[%c0, %c0_2, %c0_3, %c0_4] : memref<1x2x16x128xf32, #tpu.memory_space<vmem>>, vector<1x2x16x128xf32>
    %6 = vector.shape_cast %5 : vector<1x2x16x128xf32> to vector<2x16x128xf32>
    %c0_5 = arith.constant 0 : index
    %c0_6 = arith.constant 0 : index
    %c0_7 = arith.constant 0 : index
    %c0_8 = arith.constant 0 : index
    %7 = vector.load %arg3[%c0_5, %c0_6, %c0_7, %c0_8] : memref<1x3x16x128xf32, #tpu.memory_space<vmem>>, vector<1x3x16x128xf32>
    %8 = vector.shape_cast %7 : vector<1x3x16x128xf32> to vector<3x16x128xf32>
    %c16_i32 = arith.constant 16 : i32
    %9 = arith.muli %arg1, %c16_i32 : i32
    %10 = vector.extract_strided_slice %6 {offsets = [0, 0, 1], sizes = [2, 16, 127], strides = [1, 1, 1]} : vector<2x16x128xf32> to vector<2x16x127xf32>
    %11 = vector.extract_strided_slice %6 {offsets = [0, 0, 0], sizes = [2, 16, 127], strides = [1, 1, 1]} : vector<2x16x128xf32> to vector<2x16x127xf32>
    %12 = arith.subf %10, %11 : vector<2x16x127xf32>
    %13 = math.absf %12 : vector<2x16x127xf32>
    %cst = arith.constant dense<0.000000e+00> : vector<16x127xf32>
    %14 = vector.multi_reduction <add>, %13, %cst [0] : vector<2x16x127xf32> to vector<16x127xf32>
    %15 = vector.extract_strided_slice %8 {offsets = [0, 0, 1], sizes = [3, 16, 127], strides = [1, 1, 1]} : vector<3x16x128xf32> to vector<3x16x127xf32>
    %16 = vector.extract_strided_slice %8 {offsets = [0, 0, 0], sizes = [3, 16, 127], strides = [1, 1, 1]} : vector<3x16x128xf32> to vector<3x16x127xf32>
    %17 = arith.subf %15, %16 : vector<3x16x127xf32>
    %18 = arith.mulf %17, %17 : vector<3x16x127xf32>
    %cst_9 = arith.constant dense<0.000000e+00> : vector<16x127xf32>
    %19 = vector.multi_reduction <add>, %18, %cst_9 [0] : vector<3x16x127xf32> to vector<16x127xf32>
    %cst_10 = arith.constant 0.333333343 : f32
    %20 = vector.broadcast %cst_10 : f32 to vector<16x127xf32>
    %21 = arith.mulf %19, %20 : vector<16x127xf32>
    %cst_11 = arith.constant -2.250000e+04 : f32
    %22 = vector.broadcast %cst_11 : f32 to vector<16x127xf32>
    %23 = arith.mulf %22, %21 : vector<16x127xf32>
    %24 = math.exp %23 : vector<16x127xf32>
    %25 = arith.mulf %24, %14 : vector<16x127xf32>
    %26 = tpu.iota {dimensions = array<i32: 1>} : vector<16x127xi32>
    %27 = tpu.iota {dimensions = array<i32: 0>} : vector<16x127xi32>
    %28 = vector.broadcast %9 : i32 to vector<16x127xi32>
    %29 = arith.addi %27, %28 : vector<16x127xi32>
    %c15_i32 = arith.constant 15 : i32
    %30 = vector.broadcast %c15_i32 : i32 to vector<16x127xi32>
    %31 = arith.cmpi slt, %26, %30 : vector<16x127xi32>
    %c16_i32_12 = arith.constant 16 : i32
    %32 = vector.broadcast %c16_i32_12 : i32 to vector<16x127xi32>
    %33 = arith.cmpi slt, %29, %32 : vector<16x127xi32>
    %34 = arith.andi %31, %33 : vector<16x127xi1>
    %cst_13 = arith.constant 0.000000e+00 : f32
    %35 = vector.broadcast %cst_13 : f32 to vector<16x127xf32>
    %36 = arith.select %34, %25, %35 : vector<16x127xi1>, vector<16x127xf32>
    %37 = vector.shape_cast %36 : vector<16x127xf32> to vector<1x16x127xf32>
    %cst_14 = arith.constant dense<0.000000e+00> : vector<1xf32>
    %38 = vector.multi_reduction <add>, %37, %cst_14 [1, 2] : vector<1x16x127xf32> to vector<1xf32>
    %39 = vector.shape_cast %38 : vector<1xf32> to vector<1x1x1xf32>
    %40 = vector.extract %39[0, 0, 0] : f32 from vector<1x1x1xf32>
    %41 = vector.broadcast %40 : f32 to vector<1x1xf32>
    %42 = vector.extract_strided_slice %6 {offsets = [0, 1, 0], sizes = [2, 15, 128], strides = [1, 1, 1]} : vector<2x16x128xf32> to vector<2x15x128xf32>
    %43 = vector.extract_strided_slice %6 {offsets = [0, 0, 0], sizes = [2, 15, 128], strides = [1, 1, 1]} : vector<2x16x128xf32> to vector<2x15x128xf32>
    %44 = arith.subf %42, %43 : vector<2x15x128xf32>
    %45 = math.absf %44 : vector<2x15x128xf32>
    %cst_15 = arith.constant dense<0.000000e+00> : vector<15x128xf32>
    %46 = vector.multi_reduction <add>, %45, %cst_15 [0] : vector<2x15x128xf32> to vector<15x128xf32>
    %47 = vector.extract_strided_slice %8 {offsets = [0, 1, 0], sizes = [3, 15, 128], strides = [1, 1, 1]} : vector<3x16x128xf32> to vector<3x15x128xf32>
    %48 = vector.extract_strided_slice %8 {offsets = [0, 0, 0], sizes = [3, 15, 128], strides = [1, 1, 1]} : vector<3x16x128xf32> to vector<3x15x128xf32>
    %49 = arith.subf %47, %48 : vector<3x15x128xf32>
    %50 = arith.mulf %49, %49 : vector<3x15x128xf32>
    %cst_16 = arith.constant dense<0.000000e+00> : vector<15x128xf32>
    %51 = vector.multi_reduction <add>, %50, %cst_16 [0] : vector<3x15x128xf32> to vector<15x128xf32>
    %cst_17 = arith.constant 0.333333343 : f32
    %52 = vector.broadcast %cst_17 : f32 to vector<15x128xf32>
    %53 = arith.mulf %51, %52 : vector<15x128xf32>
    %cst_18 = arith.constant -2.250000e+04 : f32
    %54 = vector.broadcast %cst_18 : f32 to vector<15x128xf32>
    %55 = arith.mulf %54, %53 : vector<15x128xf32>
    %56 = math.exp %55 : vector<15x128xf32>
    %57 = arith.mulf %56, %46 : vector<15x128xf32>
    %58 = tpu.iota {dimensions = array<i32: 1>} : vector<15x128xi32>
    %59 = tpu.iota {dimensions = array<i32: 0>} : vector<15x128xi32>
    %60 = vector.broadcast %9 : i32 to vector<15x128xi32>
    %61 = arith.addi %59, %60 : vector<15x128xi32>
    %c16_i32_19 = arith.constant 16 : i32
    %62 = vector.broadcast %c16_i32_19 : i32 to vector<15x128xi32>
    %63 = arith.cmpi slt, %58, %62 : vector<15x128xi32>
    %c15_i32_20 = arith.constant 15 : i32
    %64 = vector.broadcast %c15_i32_20 : i32 to vector<15x128xi32>
    %65 = arith.cmpi slt, %61, %64 : vector<15x128xi32>
    %66 = arith.andi %63, %65 : vector<15x128xi1>
    %cst_21 = arith.constant 0.000000e+00 : f32
    %67 = vector.broadcast %cst_21 : f32 to vector<15x128xf32>
    %68 = arith.select %66, %57, %67 : vector<15x128xi1>, vector<15x128xf32>
    %69 = vector.shape_cast %68 : vector<15x128xf32> to vector<1x15x128xf32>
    %cst_22 = arith.constant dense<0.000000e+00> : vector<1xf32>
    %70 = vector.multi_reduction <add>, %69, %cst_22 [1, 2] : vector<1x15x128xf32> to vector<1xf32>
    %71 = vector.shape_cast %70 : vector<1xf32> to vector<1x1x1xf32>
    %72 = vector.extract %71[0, 0, 0] : f32 from vector<1x1x1xf32>
    %73 = vector.broadcast %72 : f32 to vector<1x1xf32>
    %c0_23 = arith.constant 0 : index
    %c0_24 = arith.constant 0 : index
    %74 = vector.load %arg4[%c0_23, %c0_24] : memref<1x1xf32, #tpu.memory_space<vmem>>, vector<1x1xf32>
    %cst_25 = arith.constant 5.2083336E-4 : f32
    %75 = vector.broadcast %cst_25 : f32 to vector<1x1xf32>
    %76 = arith.mulf %73, %75 : vector<1x1xf32>
    %cst_26 = arith.constant 5.2083336E-4 : f32
    %77 = vector.broadcast %cst_26 : f32 to vector<1x1xf32>
    %78 = arith.mulf %41, %77 : vector<1x1xf32>
    %79 = arith.addf %76, %78 : vector<1x1xf32>
    %80 = arith.addf %74, %79 : vector<1x1xf32>
    %c0_27 = arith.constant 0 : index
    %c0_28 = arith.constant 0 : index
    %81 = vector.load %arg4[%c0_27, %c0_28] : memref<1x1xf32, #tpu.memory_space<vmem>>, vector<1x1xf32>
    tpu.vector_store %arg4[%c0_27, %c0_28], %80 {strides = array<i32>} : memref<1x1xf32, #tpu.memory_space<vmem>>, vector<1x1xf32>,
    %c0_i32_29 = arith.constant 0 : i32
    %82 = arith.cmpi sgt, %arg1, %c0_i32_29 : i32
    %83 = arith.extui %82 : i1 to i32
    %c0_i32_30 = arith.constant 0 : i32
    %84 = arith.cmpi ne, %83, %c0_i32_30 : i32
    scf.if %84 {
      %c0_37 = arith.constant 0 : index
      %c0_38 = arith.constant 0 : index
      %c0_39 = arith.constant 0 : index
      %89 = vector.load %arg5[%c0_37, %c0_38, %c0_39] : memref<2x1x128xf32, #tpu.memory_space<vmem>>, vector<2x1x128xf32>
      %90 = vector.extract_strided_slice %6 {offsets = [0, 0, 0], sizes = [2, 1, 128], strides = [1, 1, 1]} : vector<2x16x128xf32> to vector<2x1x128xf32>
      %91 = arith.subf %90, %89 : vector<2x1x128xf32>
      %92 = math.absf %91 : vector<2x1x128xf32>
      %cst_40 = arith.constant dense<0.000000e+00> : vector<1x128xf32>
      %93 = vector.multi_reduction <add>, %92, %cst_40 [0] : vector<2x1x128xf32> to vector<1x128xf32>
      %94 = vector.extract_strided_slice %8 {offsets = [0, 0, 0], sizes = [3, 1, 128], strides = [1, 1, 1]} : vector<3x16x128xf32> to vector<3x1x128xf32>
      %c0_41 = arith.constant 0 : index
      %c0_42 = arith.constant 0 : index
      %c0_43 = arith.constant 0 : index
      %95 = vector.load %arg6[%c0_41, %c0_42, %c0_43] : memref<3x1x128xf32, #tpu.memory_space<vmem>>, vector<3x1x128xf32>
      %96 = arith.subf %94, %95 : vector<3x1x128xf32>
      %97 = arith.mulf %96, %96 : vector<3x1x128xf32>
      %cst_44 = arith.constant dense<0.000000e+00> : vector<1x128xf32>
      %98 = vector.multi_reduction <add>, %97, %cst_44 [0] : vector<3x1x128xf32> to vector<1x128xf32>
      %cst_45 = arith.constant 0.333333343 : f32
      %99 = vector.broadcast %cst_45 : f32 to vector<1x128xf32>
      %100 = arith.mulf %98, %99 : vector<1x128xf32>
      %cst_46 = arith.constant -2.250000e+04 : f32
      %101 = vector.broadcast %cst_46 : f32 to vector<1x128xf32>
      %102 = arith.mulf %101, %100 : vector<1x128xf32>
      %103 = math.exp %102 : vector<1x128xf32>
      %104 = arith.mulf %103, %93 : vector<1x128xf32>
      %105 = tpu.iota {dimensions = array<i32: 1>} : vector<1x128xi32>
      %c16_i32_47 = arith.constant 16 : i32
      %106 = vector.broadcast %c16_i32_47 : i32 to vector<1x128xi32>
      %107 = arith.cmpi slt, %105, %106 : vector<1x128xi32>
      %cst_48 = arith.constant 0.000000e+00 : f32
      %108 = vector.broadcast %cst_48 : f32 to vector<1x128xf32>
      %109 = arith.select %107, %104, %108 : vector<1x128xi1>, vector<1x128xf32>
      %110 = vector.shape_cast %109 : vector<1x128xf32> to vector<1x1x128xf32>
      %cst_49 = arith.constant dense<0.000000e+00> : vector<1xf32>
      %111 = vector.multi_reduction <add>, %110, %cst_49 [1, 2] : vector<1x1x128xf32> to vector<1xf32>
      %112 = vector.shape_cast %111 : vector<1xf32> to vector<1x1x1xf32>
      %113 = vector.extract %112[0, 0, 0] : f32 from vector<1x1x1xf32>
      %114 = vector.broadcast %113 : f32 to vector<1x1xf32>
      %c0_50 = arith.constant 0 : index
      %c0_51 = arith.constant 0 : index
      %115 = vector.load %arg4[%c0_50, %c0_51] : memref<1x1xf32, #tpu.memory_space<vmem>>, vector<1x1xf32>
      %cst_52 = arith.constant 5.2083336E-4 : f32
      %116 = vector.broadcast %cst_52 : f32 to vector<1x1xf32>
      %117 = arith.mulf %114, %116 : vector<1x1xf32>
      %118 = arith.addf %115, %117 : vector<1x1xf32>
      %c0_53 = arith.constant 0 : index
      %c0_54 = arith.constant 0 : index
      %119 = vector.load %arg4[%c0_53, %c0_54] : memref<1x1xf32, #tpu.memory_space<vmem>>, vector<1x1xf32>
      tpu.vector_store %arg4[%c0_53, %c0_54], %118 {strides = array<i32>} : memref<1x1xf32, #tpu.memory_space<vmem>>, vector<1x1xf32>,
    } else {
    }
    %85 = vector.extract_strided_slice %6 {offsets = [0, 15, 0], sizes = [2, 1, 128], strides = [1, 1, 1]} : vector<2x16x128xf32> to vector<2x1x128xf32>
    %c0_31 = arith.constant 0 : index
    %c0_32 = arith.constant 0 : index
    %c0_33 = arith.constant 0 : index
    %86 = vector.load %arg5[%c0_31, %c0_32, %c0_33] : memref<2x1x128xf32, #tpu.memory_space<vmem>>, vector<2x1x128xf32>
    tpu.vector_store %arg5[%c0_31, %c0_32, %c0_33], %85 {strides = array<i32>} : memref<2x1x128xf32, #tpu.memory_space<vmem>>, vector<2x1x128xf32>,
    %87 = vector.extract_strided_slice %8 {offsets = [0, 15, 0], sizes = [3, 1, 128], strides = [1, 1, 1]} : vector<3x16x128xf32> to vector<3x1x128xf32>
    %c0_34 = arith.constant 0 : index
    %c0_35 = arith.constant 0 : index
    %c0_36 = arith.constant 0 : index
    %88 = vector.load %arg6[%c0_34, %c0_35, %c0_36] : memref<3x1x128xf32, #tpu.memory_space<vmem>>, vector<3x1x128xf32>
    tpu.vector_store %arg6[%c0_34, %c0_35, %c0_36], %87 {strides = array<i32>} : memref<3x1x128xf32, #tpu.memory_space<vmem>>, vector<3x1x128xf32>,
    return
  }
  func.func @transform_0(%arg0: i32, %arg1: i32) -> (i32, i32, i32, i32) {
    %c0_i32 = arith.constant 0 : i32
    %c0_i32_0 = arith.constant 0 : i32
    %c0_i32_1 = arith.constant 0 : i32
    return %arg0, %c0_i32, %arg1, %c0_i32_0 : i32, i32, i32, i32
  }
  func.func @transform_1(%arg0: i32, %arg1: i32) -> (i32, i32, i32, i32) {
    %c0_i32 = arith.constant 0 : i32
    %c0_i32_0 = arith.constant 0 : i32
    %c0_i32_1 = arith.constant 0 : i32
    return %arg0, %c0_i32, %arg1, %c0_i32_0 : i32, i32, i32, i32
  }
  func.func @transform_2(%arg0: i32, %arg1: i32) -> (i32, i32) {
    %c0_i32 = arith.constant 0 : i32
    %c0_i32_0 = arith.constant 0 : i32
    %c0_i32_1 = arith.constant 0 : i32
    return %c0_i32, %c0_i32_0 : i32, i32
  }
}

</mosaic_0001>

<bundles_post_ra>
// kernel: tpu_custom_call.1
= control target key start
LH: loop header
LB: loop body
LE: loop exit
PB: predicated region body
PF: predicated region fallthrough
CT: control target
= control target key end

     0   :  { %7 = vsyncpa [#allocation5], 0  ;;  %s1076_s0 = inlined_call_operand.hbm [shape: f32[2,2,16,128], index: 0, kind: input, shape index: {}]   ;;  %s1077_s1 = inlined_call_operand.hbm [shape: f32[2,3,16,128], index: 1, kind: input, shape index: {}]   ;;  %s1078_s2 = inlined_call_operand.hbm [shape: f32[1,1], index: 2, kind: output, shape index: {}]  }
   0x1   :  { %9 = vsyncpa [#allocation5 + $0x1], 0 }
   0x2   :  { %10 = vsyncpa [#allocation8], 0 }
   0x3   :  { %12 = vsyncpa [#allocation8 + $0x1], 0 }
   0x4   :  { %13 = vsyncpa [#allocation6], 0  ;;  %s883_s9 = smov 0   ;;  %s885_s10 = smov 0  }
   0x5   :  { %s887_s11 = smov 0   ;;  %s889_s12 = smov 0  }
   0x6   :  { %s891_s13 = smov 0   ;;  %s893_s14 = smov 0  }
   0x7 LB: > { %s611_s15 = sadd.s32 4294967295, %s860_s14   ;;  %s31_s16 = sadd.s32 1, %s856_s13  ;;  %s860_s14 = sphi %s893_s14, %s19_s14   ;;  %s856_s13 = sphi %s891_s13, %s1086_s13   ;;  %s852_s12 = sphi %s889_s12, %s1085_s12   ;;  %s848_s11 = sphi %s887_s11, %s1084_s11   ;;  %s844_s10 = sphi %s885_s10, %s1083_s10   ;;  %s840_s9 = sphi %s883_s9, %s1082_s9  }
   0x8   : > { %p33_p0 = scmp.ge.s32.totalorder %s31_s16, 2  ;;  %s40_s17 = sadd.s32 1, %s848_s11 }
   0x9   : > { %p47_p1 = scmp.ne.s32.totalorder %s848_s11, %s844_s10  ;;  %p48_p2 = scmp.eq.s32.totalorder %s860_s14, 0 }
   0xa   : > { %s1088_s16 = smov (%p33_p0, %s31_s16), 0  ;;  %p53_p4 = scmp.ne.s32.totalorder %s844_s10, %s840_s9 }
   0xb   : > { %p919_p3 = por %p48_p2, %p47_p1  ;;  %s35_s19 = ssub.s32 %s856_s13, %s1088_s16 }
   0xc   : > { %p54_p5 = scmp.eq.s32.totalorder %s611_s15, 0  ;;  %p38_p6 = scmp.eq.s32.totalorder %s35_s19, 0 }
   0xd   : > { %p649_p8 = scmp.lt.s32.totalorder %s860_s14, 2  ;;  %s937_s22 = sand.u32 1, %s848_s11  }
   0xe   : > { %p928_p7 = por %p54_p5, %p53_p4  ;;  %s625_s23 = sshll.u32 %s856_s13, 5 }
   0xf   : > { %s934_s21 = scalar_select %p38_p6, %s848_s11, %s40_s17  }
  0x10   : > { %s614_s24 = sshll.u32 %s937_s22, 5  ;;  %s137_s27 = scalar_lea.hbm %s1076_s0, %s625_s23 }
  0x11   : > { %s138_s28 = sshll.u32 %s137_s27, 4  ;;  %s130_s29 = scalar_lea.vmem [#allocation4], %s614_s24  ;;  %s139_s28 = int_to_ptr.hbm [resolvable:$true] %s138_s28 }
  0x12   : > { %s140_s30 = sshll.u32 %s130_s29, 4  ;;  %p946_p9 = pnand %p649_p8, %p919_p3  ;;  %s141_s30 = int_to_ptr.vmem [resolvable:$true] %s140_s30 }
  0x13   : > { %p618_p10 = scmp.ge.s32.totalorder %s860_s14, 1  ;;  %p172_p11 = scmp.lt.s32.totalorder %s860_s14, 3 }
  0x14   : > { %s127_s4 = scalar_lea.sflag [#allocation5], %s937_s22  ;;  %s862_s5 = smov 128  }
  0x15   : > { %s863_s6 = smov 8   ;;  %p173_p12 = pnand %p618_p10, %p172_p11 }
  0x16   : > { %645 = dma.hbm_to_vmem [thread:$0]  (!%p946_p9), %s139_s28, 512, %s141_s30, %s127_s4, %s862_s5, %s862_s5, %s863_s6  }
  0x17   : > { %s627_s7 = smul.u32 48, %s937_s22  ;;  %s151_s25 = scalar_lea.sflag [#allocation8], %s937_s22 }
  0x18   : > { %s628_s8 = smul.u32 48, %s856_s13  ;;  %s178_s26 = sand.u32 (!%p173_p12), 1, %s844_s10  }
  0x19   : > { %s154_s19 = scalar_lea.vmem [#allocation7], %s627_s7  ;;  %176 = sbr.rel (%p173_p12) target bundleno = 492 (0x1ec), region = 28 }
  0x1a   : > { %s161_s18 = scalar_lea.hbm %s1077_s1, %s628_s8  ;;  %s164_s23 = sshll.u32 %s154_s19, 4  ;;  %s165_s23 = int_to_ptr.vmem [resolvable:$true] %s164_s23 }
  0x1b   : > { %s162_s24 = sshll.u32 %s161_s18, 4  ;;  %s619_s27 = sshll.u32 (!%p173_p12), %s178_s26, 5  ;;  %s163_s24 = int_to_ptr.hbm [resolvable:$true] %s162_s24 }
  0x1c   : > { %648 = dma.hbm_to_vmem [thread:$0]  (!%p946_p9), %s163_s24, 768, %s165_s23, %s151_s25, %s862_s5, %s862_s5, %s863_s6  }
  0x1d   : > { %s179_s28 = scalar_lea.sflag (!%p173_p12), [#allocation5], %s178_s26  ;;  %s182_s29 = scalar_lea.vmem (!%p173_p12), [#allocation4], %s619_s27 }
  0x1e   : > { %827 = dma.done.wait (%p928_p7), %s179_s28, 512  }
  0x1f   : > { %829 = vsyncadd (%p928_p7), %s179_s28, 4294966784  ;;  %s629_s30 = smul.u32 48, %s178_s26  ;;  %s189_s4 = scalar_lea.sflag [#allocation8], %s178_s26 }
  0x21   : > { %s192_s7 = scalar_lea.vmem [#allocation7], %s629_s30 }
  0x22   : > { %831 = dma.done.wait (%p928_p7), %s189_s4, 768  }
  0x23   : > { %833 = vsyncadd (%p928_p7), %s189_s4, 4294966528  ;;  %p216_p13 = scmp.eq.s32.totalorder %s852_s12, 0 }
  0x24   : > { %vm222_vm0 = vcmask (%p216_p13), 0   ;;  %v864_v0 = vmov (%p216_p13), 0.0  }
  0x25   : > { %221 = sbr.rel (!%p216_p13) target bundleno = 42 (0x2a), region = 40  ;;  %223 = vst.msk [vmem:[#allocation9] sm:$0x1] (%p216_p13), %vm222_vm0, %v864_v0 }
  0x2a PF: > { %v973_v1 = vld [vmem:[%s192_s7 + $0x10] sm:$0xff]  ;;  %v975_v2 = vld [vmem:[%s192_s7] sm:$0xff]  ;;  %v977_v3 = vld [vmem:[%s192_s7 + $0x18] sm:$0xff]  ;;  %s865_s22 = smov 1   ;;  %vm259_vm1 = vcmask 1047560   ;;  %s866_s12 = smov 127  }
  0x2b   : > { %276 = vrot.lane.b32.xlu1 %v973_v1, %s865_s22  ;;  %272 = vrot.lane.b32.xlu0 %v975_v2, %s865_s22  ;;  %v981_v4 = vld [vmem:[%s192_s7 + $0x8] sm:$0xff]  ;;  %v983_v5 = vld [vmem:[%s192_s7 + $0x20] sm:$0xff]  ;;  %vm378_vm2 = vcmask 1047553   ;;  %vm359_vm3 = vcmask 1040384   ;;  %vm434_vm7 = vcmask 1046528   ;;  %vm345_vm9 = vcmask 1039360  }
  0x2c   : > { %v985_v6 = vld [vmem:[%s182_s29 + $0x8] sm:$0xff]  ;;  %280 = vrot.lane.b32.xlu2 %v983_v5, %s865_s22  ;;  %v988_v7 = vld [vmem:[%s182_s29 + $0x18] sm:$0xff]  ;;  %v995_v9 = vld [vmem:[%s182_s29] sm:$0xff]  ;;  %s867_s5 = smov [#allocation9]   ;;  %s522_s17 = sshll.u32 %s1078_s2, 4  ;;  %vm459_vm10 = vcmask 0   ;;  %s523_s17 = int_to_ptr.hbm [resolvable:$true] %s522_s17 }
  0x2d   : > { %v990_v8 = vld [vmem:[%s192_s7 + $0x28] sm:$0xff]  ;;  %v997_v10 = vld [vmem:[%s182_s29 + $0x10] sm:$0xff]  ;;  %s520_s6 = sshll.u32 %s867_s5, 4  ;;  %p650_p0 = scmp.eq.s32.totalorder %s611_s15, 1  ;;  %s521_s6 = int_to_ptr.vmem [resolvable:$true] %s520_s6 }
  0x33   : > { %278 = vrot.lane.b32.xlu1 %v977_v3, %s865_s22  ;;  %274 = vrot.lane.b32.xlu0 %v981_v4, %s865_s22 }
  0x34   : > { %282 = vrot.lane.b32.xlu2 %v990_v8, %s865_s22 }
  0x3b   : > { %239 = vrot.lane.b32.xlu0 %v995_v9, %s865_s22  ;;  %241 = vrot.lane.b32.xlu1 %v985_v6, %s865_s22 }
  0x3c   : > { %243 = vrot.lane.b32.xlu2 %v997_v10, %s865_s22 }
  0x43   : > { %245 = vrot.lane.b32.xlu0 %v988_v7, %s865_s22 }
  0x86   : > { %v281_v11 = vpop.permute.xlu2 %280 }
  0x87   : > { %v294_v13 = vsub.f32 %v983_v5, %v281_v11 }
  0x89   : > { %v300_v18 = vmul.f32 %v294_v13, %v294_v13  ;;  %v386_v13 = vrot.slane %v973_v1, 7 }
  0x8b   : > { %v305_v24 = vsel %vm259_vm1, %v300_v18, 0.0 }
  0x8e   : > { %v283_v12 = vpop.permute.xlu2 %282 }
  0x8f   : > { %v295_v25 = vsub.f32 %v990_v8, %v283_v12 }
  0x91   : > { %v301_v33 = vmul.f32 %v295_v25, %v295_v25 }
  0x93   : > { %v310_v42 = vsel %vm259_vm1, %v301_v33, 0.0 }
  0x96   : > { %v244_v26 = vpop.permute.xlu2 %243 }
  0x97   : > { %v253_v36 = vsub.f32 %v997_v10, %v244_v26 }
  0x99   : > { %v257_v43 = vand.u32 2147483647, %v253_v36 }
  0x9b   : > { %v261_v49 = vsel %vm259_vm1, %v257_v43, 0.0 }
  0x9d   : > { %v277_v14 = vpop.permute.xlu1 %276  ;;  %v273_v15 = vpop.permute.xlu0 %272 }
  0x9e   : > { %v292_v16 = vsub.f32 %v973_v1, %v277_v14  ;;  %v290_v17 = vsub.f32 %v975_v2, %v273_v15  ;;  %v383_v14 = vrot.slane %v975_v2, 7  ;;  %v400_v15 = vsub.f32 %v973_v1, %v386_v13 }
  0xa0   : > { %v298_v19 = vmul.f32 %v292_v16, %v292_v16  ;;  %v296_v20 = vmul.f32 %v290_v17, %v290_v17  ;;  %v398_v16 = vsub.f32 %v975_v2, %v383_v14  ;;  %v389_v17 = vrot.slane %v983_v5, 7 }
  0xa1   : > { %v406_v18 = vmul.f32 %v400_v15, %v400_v15 }
  0xa2   : > { %v303_v21 = vsel %vm259_vm1, %v298_v19, 0.0  ;;  %v302_v22 = vsel %vm259_vm1, %v296_v20, 0.0  ;;  %v404_v19 = vmul.f32 %v398_v16, %v398_v16  ;;  %v402_v20 = vsub.f32 %v983_v5, %v389_v17 }
  0xa3   : > { %v304_v23 = vadd.f32 %v303_v21, %v302_v22  ;;  %v387_v21 = vrot.slane %v977_v3, 7  ;;  %v384_v22 = vrot.slane %v981_v4, 7 }
  0xa4   : > { %v408_v25 = vmul.f32 %v402_v20, %v402_v20 }
  0xa5   : > { %v306_v27 = vadd.f32 %v305_v24, %v304_v23  ;;  %v279_v28 = vpop.permute.xlu1 %278  ;;  %v275_v29 = vpop.permute.xlu0 %274  ;;  %v411_v23 = vsel %vm378_vm2, %v406_v18, 0.0  ;;  %v410_v24 = vsel %vm378_vm2, %v404_v19, 0.0  ;;  %v388_v2 = vsel %vm359_vm3, %v386_v13, %v387_v21 }
  0xa6   : > { %v293_v30 = vsub.f32 %v977_v3, %v279_v28  ;;  %v291_v31 = vsub.f32 %v981_v4, %v275_v29  ;;  %v412_v1 = vadd.f32 %v411_v23, %v410_v24  ;;  %v385_v26 = vsel %vm359_vm3, %v383_v14, %v384_v22 }
  0xa7   : > { %v312_v32 = vmul.f32 0.33333334, %v306_v27  ;;  %v390_v27 = vrot.slane %v990_v8, 7  ;;  %v413_v5 = vsel %vm378_vm2, %v408_v25, 0.0  ;;  %v401_v28 = vsub.f32 %v977_v3, %v388_v2 }
  0xa8   : > { %v299_v34 = vmul.f32 %v293_v30, %v293_v30  ;;  %v297_v35 = vmul.f32 %v291_v31, %v291_v31  ;;  %v399_v29 = vsub.f32 %v981_v4, %v385_v26  ;;  %v414_v30 = vadd.f32 %v413_v5, %v412_v1 }
  0xa9   : > { %v314_v37 = vmul.f32 -22500.0, %v312_v32  ;;  %v391_v31 = vsel %vm359_vm3, %v389_v17, %v390_v27  ;;  %v407_v32 = vmul.f32 %v401_v28, %v401_v28 }
  0xaa   : > { %v308_v38 = vsel %vm259_vm1, %v299_v34, 0.0  ;;  %v307_v39 = vsel %vm259_vm1, %v297_v35, 0.0  ;;  %v405_v33 = vmul.f32 %v399_v29, %v399_v29  ;;  %v403_v34 = vsub.f32 %v990_v8, %v391_v31 }
  0xab   : > { %v316_v40 = vmul.f32 1.442695, %v314_v37  ;;  %v309_v41 = vadd.f32 %v308_v38, %v307_v39  ;;  %v417_v35 = vmul.f32 0.33333334, %v414_v30  ;;  %v360_v38 = vrot.slane %v995_v9, 7 }
  0xac   : > { %v415_v36 = vadd.f32 %v407_v32, %v405_v33  ;;  %v409_v37 = vmul.f32 %v403_v34, %v403_v34  ;;  %v361_v8 = vrot.slane %v985_v6, 7 }
  0xad   : > { %706 = vpow2.f32 %v316_v40  ;;  %v311_v44 = vadd.f32 %v310_v42, %v309_v41  ;;  %v240_v45 = vpop.permute.xlu0 %239  ;;  %v242_v46 = vpop.permute.xlu1 %241  ;;  %v419_v39 = vmul.f32 -22500.0, %v417_v35  ;;  %v363_v40 = vrot.slane %v997_v10, 7 }
  0xae   : > { %v251_v47 = vsub.f32 %v995_v9, %v240_v45  ;;  %v252_v51 = vsub.f32 %v985_v6, %v242_v46  ;;  %v416_v41 = vadd.f32 %v415_v36, %v409_v37  ;;  %v370_v3 = vsub.f32 %v995_v9, %v360_v38 }
  0xaf   : > { %v313_v48 = vmul.f32 0.33333334, %v311_v44  ;;  %v421_v42 = vmul.f32 1.442695, %v419_v39  ;;  %v372_v4 = vsub.f32 %v997_v10, %v363_v40  ;;  %v364_v46 = vrot.slane %v988_v7, 7 }
  0xb0   : > { %v255_v50 = vand.u32 2147483647, %v251_v47  ;;  %v256_v57 = vand.u32 2147483647, %v252_v51  ;;  %v418_v43 = vmul.f32 0.33333334, %v416_v41  ;;  %v322_v51 = vlaneseq }
  0xb1   : > { %v315_v52 = vmul.f32 -22500.0, %v313_v48  ;;  %v374_v44 = vand.u32 2147483647, %v370_v3  ;;  %v376_v45 = vand.u32 2147483647, %v372_v4  ;;  %v362_v9 = vsel %vm359_vm3, %v360_v38, %v361_v8 }
  0xb2   : > { %v260_v53 = vsel %vm259_vm1, %v255_v50, 0.0  ;;  %v263_v61 = vsel %vm259_vm1, %v256_v57, 0.0  ;;  %v420_v47 = vmul.f32 -22500.0, %v418_v43  ;;  %v323_v57 = vand.u32 127, %v322_v51 }
  0xb3   : > { %v707_v54 = vpop.eup %706  ;;  %v318_v55 = vmul.f32 1.442695, %v315_v52  ;;  %v262_v56 = vadd.f32 %v261_v49, %v260_v53  ;;  %v379_v49 = vsel %vm378_vm2, %v374_v44, 0.0  ;;  %v380_v50 = vsel %vm378_vm2, %v376_v45, 0.0  ;;  %v454_v38 = vld [vmem:[#allocation9] sm:$0x1] }
  0xb4   : > { %v423_v48 = vmul.f32 1.442695, %v420_v47  ;;  %v365_v52 = vsel %vm359_vm3, %v363_v40, %v364_v46  ;;  %v371_v53 = vsub.f32 %v985_v6, %v362_v9  ;;  %vm427_vm4 = vcmp.lt.s32.totalorder %v323_v57, 16 }
  0xb5   : > { %708 = vpow2.f32 %v318_v55  ;;  %v246_v58 = vpop.permute.xlu0 %245  ;;  %v320_v59 = vmul.f32 %v707_v54, %v262_v56  ;;  %v373_v54 = vsub.f32 %v988_v7, %v365_v52  ;;  %v325_v55 = vshrl.u32 %v322_v51, 7 }
  0xb6   : > { %v254_v60 = vsub.f32 %v988_v7, %v246_v58  ;;  %710 = vpow2.f32 %v421_v42  ;;  %v381_v56 = vadd.f32 %v380_v50, %v379_v49  ;;  %v375_v58 = vand.u32 2147483647, %v371_v53 }
  0xb7   : > { %337 = vrot.lane.b32.xlu1 %v320_v59, %s866_s12  ;;  %712 = vpow2.f32 %v423_v48  ;;  %v377_v59 = vand.u32 2147483647, %v373_v54  ;;  %vm330_vm8 = vcmp.lt.s32.totalorder %v323_v57, 15 }
  0xb8   : > { %v258_v62 = vand.u32 2147483647, %v254_v60  ;;  %v326_v60 = vadd.s32 8, %v325_v55 }
  0xba   : > { %v264_v63 = vsel %vm259_vm1, %v258_v62, 0.0  ;;  %v382_v62 = vadd.f32 %v377_v59, %v375_v58  ;;  %vm429_vm5 = vcmp.lt.s32.totalorder %v326_v60, 15 }
  0xbb   : > { %v709_v0 = vpop.eup %708  ;;  %v265_v11 = vadd.f32 %v264_v63, %v263_v61  ;;  %vm431_vm6 = vmand %vm427_vm4, %vm429_vm5 }
  0xbc   : > { %v711_v10 = vpop.eup %710 }
  0xbd   : > { %v321_v12 = vmul.f32 %v709_v0, %v265_v11  ;;  %v425_v61 = vmul.f32 %v711_v10, %v381_v56  ;;  %v713_v63 = vpop.eup %712 }
  0xbe   : > { %v426_v0 = vmul.f32 %v713_v63, %v382_v62 }
  0xbf   : > { %339 = vrot.lane.b32.xlu2 %v321_v12, %s866_s12  ;;  %v435_v11 = vrot.slane %v425_v61, 1 }
  0xc0   : > { %v436_v12 = vrot.slane %v426_v0, 1 }
  0xc2   : > { %v437_v13 = vsel %vm434_vm7, %v435_v11, %v436_v12  ;;  %v441_v6 = vsel %vm431_vm6, %v436_v12, 0.0 }
  0xc3   : > { %v440_v14 = vsel %vm427_vm4, %v437_v13, 0.0  ;;  %v442_v7 = vsel %vm434_vm7, %v441_v6, 0.0 }
  0xc4   : > { %v443_v15 = vadd.f32 %v442_v7, %v440_v14 }
  0xe1   : > { %444 = vadd.xlane.f32.xlu1 %v443_v15 }
 0x119   : > { %v340_v16 = vpop.permute.xlu2 %339 }
 0x11a   : > { %v344_v17 = vsel %vm330_vm8, %v340_v16, 0.0 }
 0x11b   : > { %v347_v20 = vsel %vm345_vm9, %v344_v17, 0.0 }
 0x129   : > { %v338_v18 = vpop.permute.xlu1 %337 }
 0x12a   : > { %v343_v19 = vsel %vm330_vm8, %v338_v18, 0.0 }
 0x12b   : > { %v346_v21 = vsel %vm345_vm9, %v343_v19, 0.0 }
 0x12c   : > { %v348_v22 = vadd.f32 %v347_v20, %v346_v21 }
 0x12e   : > { %349 = vadd.xlane.f32.xlu0 %v348_v22 }
 0x154   : > { %v445_v23 = vpop.xlane.xlu1 %444 }
 0x155   : > { %v446_v24 = vrot.slane %v445_v23, 4 }
 0x157   : > { %v447_v25 = vadd.f32 %v446_v24, %v445_v23 }
 0x159   : > { %v448_v1 = vrot.slane %v447_v25, 2 }
 0x15b   : > { %v449_v5 = vadd.f32 %v448_v1, %v447_v25 }
 0x15d   : > { %v450_v30 = vrot.slane %v449_v5, 1 }
 0x15f   : > { %v451_v33 = vadd.f32 %v450_v30, %v449_v5 }
 0x1a1   : > { %v350_v2 = vpop.xlane.xlu0 %349 }
 0x1a2   : > { %v351_v26 = vrot.slane %v350_v2, 4 }
 0x1a4   : > { %v352_v27 = vadd.f32 %v351_v26, %v350_v2 }
 0x1a6   : > { %v353_v28 = vrot.slane %v352_v27, 2 }
 0x1a8   : > { %v354_v29 = vadd.f32 %v353_v28, %v352_v27 }
 0x1aa   : > { %v355_v31 = vrot.slane %v354_v29, 1 }
 0x1ac   : > { %v356_v32 = vadd.f32 %v355_v31, %v354_v29 }
 0x1ae   : > { %630 = vpush %v356_v32 }
 0x1af   : > { %632 = vpush %v451_v33 }
 0x1df   : > { %s631_s20 = spop %630 }
 0x1e0   : > { %v358_v34 = vstv %s631_s20  ;;  %s633_s3 = spop %632 }
 0x1e1   : > { %v456_v35 = vmul.f32 0.00052083336, %v358_v34  ;;  %v453_v36 = vstv %s633_s3 }
 0x1e2   : > { %v455_v37 = vmul.f32 0.00052083336, %v453_v36 }
 0x1e4   : > { %v457_v39 = vadd.f32 %v456_v35, %v455_v37 }
 0x1e6   : > { %v458_v40 = vadd.f32 %v457_v39, %v454_v38 }
 0x1e8   : > { %460 = vst.msk [vmem:[#allocation9] sm:$0x1] %vm459_vm10, %v458_v40 }
 0x1e9   : > { %639 = dma.vmem_to_hbm [thread:$0]  (%p650_p0), %s521_s6, 16, %s523_s17, [#allocation6]  }
 0x1ea   : > { %835 = dma.done.wait (%p650_p0), [#allocation6], 16  }
 0x1eb   : > { %837 = vsyncadd (%p650_p0), [#allocation6], 4294967280 }
 0x1ec PF: > { %s19_s14 = sadd.s32 1, %s860_s14   ;;  %s1082_s9 = smov %s844_s10 }
 0x1ed   : > { %p16_p1 = scmp.ge.s32.totalorder %s19_s14, 4   ;;  %s1083_s10 = smov %s848_s11 }
 0x1ee   : > { %s1084_s11 = smov %s934_s21  ;;  %s1085_s12 = smov %s856_s13 }
 0x1ef   : > { %s1086_s13 = smov %s1088_s16  ;;  %18 = sbr.rel (!%p16_p1) target bundleno = 7 (0x7), region = 86 }
 0x1f4   :  { %536 = vsyncpa [#allocation5], 1 }
 0x1f5   :  { %538 = vsyncpa [#allocation5 + $0x1], 1 }
 0x1f6   :  { %539 = vsyncpa [#allocation8], 1 }
 0x1f7   :  { %541 = vsyncpa [#allocation8 + $0x1], 1 }
 0x1f8   :  { %542 = vsyncpa [#allocation6], 1 }
 0x1f9   :  { %544 = vsyncpa [#allocation6 + $0x1], 1 }

</bundles_post_ra>
